<compile_context>
chip_gen: v5e
topology: v5e:2x2
jax: 0.10.0
libtpu: 0.0.40
codegen_flags: <defaults>
</compile_context>

<pallas_src>
import functools

import jax
import jax.numpy as jnp
from jax import lax
from jax.experimental import pallas as pl
from jax.experimental.pallas import tpu as pltpu


def unimol_emb_kernel(x_ref, w_ref, b_ref, hg_ref, pos_ref, g_ref, beta_ref, o_ref,
                      *, multi_seq_tiles: bool):
    """One grid step over M = TB*TS flattened rows (TB sequences x TS positions).

    x_ref:    (M, D) or (1, TS, D)  input features for this block (bf16 operands)
    w_ref:    (D, H)                linear weight, (in, out) layout, VMEM-resident
    b_ref:    (1, H)                linear bias (f32)
    hg_ref:   (TB, 1, H)            HG_embed rows for the sequences in this block (f32)
    pos_ref:  (M, H)                position embeddings matching the M rows (f32)
    g_ref:    (1, H)                LayerNorm gamma (f32)
    beta_ref: (1, H)                LayerNorm beta  (f32)
    o_ref:    (M, H) or (1, TS, H)
    """
    TB = hg_ref.shape[0]
    M, H = pos_ref.shape
    TS = M // TB

    x = x_ref[...]
    if x.ndim != 2:
        x = x.reshape(-1, x.shape[-1])          # (1, TS, D) -> (TS, D): trivial leading-dim squeeze

    # MXU matmul with a large, fused M dimension; f32 accumulation.
    h = jnp.dot(x, w_ref[...], preferred_element_type=jnp.float32)
    h = h + b_ref[...].astype(jnp.float32)      # (M, H) f32

    # input_embeddings[:, 0, :] = HG_embed  (row 0 of every sequence in this block).
    def splice(hh):
        rows = lax.broadcasted_iota(jnp.int32, (M, 1), 0)
        for i in range(TB):                      # TB is small & static -> unrolled
            hg_i = hg_ref[i].astype(jnp.float32)         # (1, H)
            hh = jnp.where(rows == i * TS, hg_i, hh)
        return hh

    if multi_seq_tiles:
        # Sequence is tiled along the grid: only the first seq-tile contains global row 0,
        # so skip the iota/select work entirely on the other tiles.
        h = lax.cond(pl.program_id(1) == 0, splice, lambda hh: hh, h)
    else:
        h = splice(h)

    # + position embeddings
    h = h + pos_ref[...].astype(jnp.float32)

    # LayerNorm over the hidden axis, one-pass statistics, eps = 1e-12 (matches torch module).
    mean = jnp.mean(h, axis=-1, keepdims=True)
    var = jnp.maximum(jnp.mean(h * h, axis=-1, keepdims=True) - mean * mean, 0.0)
    y = (h - mean) * lax.rsqrt(var + 1e-12)
    y = y * g_ref[...].astype(jnp.float32) + beta_ref[...].astype(jnp.float32)

    # TODO(synk): dropout omitted (eval-mode identity); training parity would need
    #             pltpu.prng_seed / pltpu.prng_random_bits masking.
    if len(o_ref.shape) != 2:
        y = y.reshape(o_ref.shape)              # (TS, H) -> (1, TS, H): trivial leading-dim expand
    o_ref[...] = y.astype(o_ref.dtype)


def _pick_seq_tile(S, max_tile):
    """Largest multiple-of-8 tile <= max_tile that divides S (or S itself if it already fits)."""
    if S <= max_tile or S % 8 != 0:
        return S
    t = (min(S, max_tile) // 8) * 8
    while t > 8 and S % t != 0:
        t -= 8
    return t if S % t == 0 else S


def _pick_batch_tile(B, S, TS, m_target):
    """How many sequences to fuse into one row block (only when a tile covers the whole sequence)."""
    if TS != S or S % 8 != 0 or B == 1:
        return 1
    tb = max(1, min(B, -(-m_target // S)))      # ceil(m_target / S), capped at B
    while B % tb != 0:
        tb -= 1
    return tb


def unimol_embeddings(input_embed, HG_embed, w_t, b, pos_table, gamma, beta, *,
                      max_seq_tile=512, m_target=256,
                      matmul_dtype=jnp.bfloat16, out_dtype=None):
    """
    input_embed: [B, S, D]   (D = 512 for drug_feat == 'unimol')
    HG_embed:    [B, H]
    w_t:         [D, H]      linear weight already transposed to (in, out) layout
    b:           [H]
    pos_table:   [P, H]      position-embedding table (P >= S, position ids are 0..S-1)
    gamma, beta: [H]         LayerNorm parameters
    returns:     [B, S, H]
    """
    B, S, D = input_embed.shape
    H = w_t.shape[1]
    if out_dtype is None:
        out_dtype = input_embed.dtype           # downstream could pass jnp.bfloat16 to halve writeback

    TS = _pick_seq_tile(S, max_seq_tile)
    TB = _pick_batch_tile(B, S, TS, m_target)
    nst = S // TS                               # number of sequence tiles
    M = TB * TS                                 # matmul M dimension per grid step

    # One-time parameter prep (XLA level, outside the hot loop).
    x_cast = input_embed.astype(matmul_dtype)
    w_cast = w_t.astype(matmul_dtype)
    pos = pos_table[:S]                         # (S, H) positions 0..S-1
    hg3 = HG_embed.reshape(B, 1, H)
    b2 = b.reshape(1, H)
    g2 = gamma.reshape(1, H)
    beta2 = beta.reshape(1, H)

    flat = (TS % 8 == 0)                        # flattened row blocks satisfy the (8, 128) rule
    kernel = functools.partial(unimol_emb_kernel, multi_seq_tiles=(nst > 1))

    if flat:
        x_in = x_cast.reshape(B * S, D)          # free metadata reshape
        x_spec = pl.BlockSpec((M, D), lambda bi, j: (bi * nst + j, 0))
        out_shape = jax.ShapeDtypeStruct((B * S, H), out_dtype)
        out_spec = pl.BlockSpec((M, H), lambda bi, j: (bi * nst + j, 0))
        if TB > 1:
            pos_in = jnp.tile(pos, (TB, 1))      # (M, H), same for every block -> VMEM-resident
            pos_spec = pl.BlockSpec((M, H), lambda bi, j: (0, 0))
        else:
            pos_in = pos
            pos_spec = pl.BlockSpec((TS, H), lambda bi, j: (j, 0))
    else:
        # S not a multiple of 8: keep the 3-D (1, S, *) layout (full-extent blocks are always legal).
        x_in = x_cast
        x_spec = pl.BlockSpec((1, S, D), lambda bi, j: (bi, 0, 0))
        out_shape = jax.ShapeDtypeStruct((B, S, H), out_dtype)
        out_spec = pl.BlockSpec((1, S, H), lambda bi, j: (bi, 0, 0))
        pos_in = pos
        pos_spec = pl.BlockSpec((S, H), lambda bi, j: (0, 0))

    out = pl.pallas_call(
        kernel,
        out_shape=out_shape,
        grid_spec=pltpu.PrefetchScalarGridSpec(
            num_scalar_prefetch=0,
            grid=(B // TB, nst),
            in_specs=[
                x_spec,                                              # activations (pipelined)
                pl.BlockSpec((D, H), lambda bi, j: (0, 0)),          # weight (VMEM-resident)
                pl.BlockSpec((1, H), lambda bi, j: (0, 0)),          # bias
                pl.BlockSpec((TB, 1, H), lambda bi, j: (bi, 0, 0)),  # HG rows for this block
                pos_spec,                                            # position embeddings
                pl.BlockSpec((1, H), lambda bi, j: (0, 0)),          # gamma
                pl.BlockSpec((1, H), lambda bi, j: (0, 0)),          # beta
            ],
            out_specs=out_spec,
        ),
        # Both grid axes are independent -> 2-TensorCore sharding on v7x (harmless on v5e/v6e).
        # No vmem_limit_bytes request: the footprint is ~2 MiB, well under every chip's default.
        compiler_params=pltpu.CompilerParams(
            dimension_semantics=("parallel", "parallel"),
        ),
    )(x_in, w_cast, b2, hg3, pos_in, g2, beta2)

    if flat:
        out = out.reshape(B, S, H)
    return out


if __name__ == "__main__":
    # Small shapes consistent with the module: drug_feat == 'unimol' -> Linear(512, hidden).
    batch, seq, hidden, in_feat = 2, 8, 128, 512
    max_position_size = 16

    key = jax.random.PRNGKey(0)
    kx, khg, kw, kb, kpos, kg, kbt = jax.random.split(key, 7)

    input_embed = jax.random.normal(kx, (batch, seq, in_feat), dtype=jnp.float32)
    HG_embed = jax.random.normal(khg, (batch, hidden), dtype=jnp.float32)
    # PyTorch nn.Linear layout: weight [out, in], bias [out].
    w = jax.random.normal(kw, (hidden, in_feat), dtype=jnp.float32) * 0.02
    b = jax.random.normal(kb, (hidden,), dtype=jnp.float32) * 0.02
    pos_table = jax.random.normal(kpos, (max_position_size, hidden), dtype=jnp.float32) * 0.02
    gamma = 1.0 + 0.1 * jax.random.normal(kg, (hidden,), dtype=jnp.float32)
    beta = 0.05 * jax.random.normal(kbt, (hidden,), dtype=jnp.float32)

    # Hoist the (out,in)->(in,out) weight transpose out of the hot path (one-time parameter prep).
    w_t = jnp.asarray(w.T)  # (in_feat, hidden)

    out = unimol_embeddings(input_embed, HG_embed, w_t, b, pos_table, gamma, beta)
    out = jax.block_until_ready(out)

    # Plain-JAX f32 reference (eval-mode dropout = identity).
    ie = jnp.einsum("bsd,hd->bsh", input_embed, w) + b
    ie = ie.at[:, 0, :].set(HG_embed)
    emb = ie + pos_table[:seq][None, :, :]
    u = emb.mean(-1, keepdims=True)
    var = ((emb - u) ** 2).mean(-1, keepdims=True)
    ref = gamma * ((emb - u) / jnp.sqrt(var + 1e-12)) + beta

    assert out.shape == (batch, seq, hidden)
    max_err = float(jnp.max(jnp.abs(out - ref)))
    assert jnp.allclose(out, ref, atol=1e-2, rtol=1e-2), max_err

    print("KERNEL_OK")
</pallas_src>

<mosaic_0001>
module attributes {stable_mosaic.version = 11 : i64} {
  func.func @unimol_emb_kernel(%arg0: i32, %arg1: i32, %arg2: memref<16x512xbf16, #tpu.memory_space<vmem>>, %arg3: memref<512x128xbf16, #tpu.memory_space<vmem>>, %arg4: memref<1x128xf32, #tpu.memory_space<vmem>>, %arg5: memref<2x1x128xf32, #tpu.memory_space<vmem>>, %arg6: memref<16x128xf32, #tpu.memory_space<vmem>>, %arg7: memref<1x128xf32, #tpu.memory_space<vmem>>, %arg8: memref<1x128xf32, #tpu.memory_space<vmem>>, %arg9: memref<16x128xf32, #tpu.memory_space<vmem>>) attributes {dimension_semantics = [#tpu.dimension_semantics<parallel>, #tpu.dimension_semantics<parallel>], iteration_bounds = array<i64: 1, 1>, scalar_prefetch = 0 : i64, scratch_operands = 0 : i64, tpu.core_type = #tpu.core_type<tc>, window_params = [{transform_indices = @transform_0, window_bounds = array<i64: 16, 512>}, {pipeline_mode = #tpu.pipeline_mode<synchronous>, transform_indices = @transform_1, window_bounds = array<i64: 512, 128>}, {pipeline_mode = #tpu.pipeline_mode<synchronous>, transform_indices = @transform_2, window_bounds = array<i64: 1, 128>}, {transform_indices = @transform_3, window_bounds = array<i64: 2, 1, 128>}, {pipeline_mode = #tpu.pipeline_mode<synchronous>, transform_indices = @transform_4, window_bounds = array<i64: 16, 128>}, {pipeline_mode = #tpu.pipeline_mode<synchronous>, transform_indices = @transform_5, window_bounds = array<i64: 1, 128>}, {pipeline_mode = #tpu.pipeline_mode<synchronous>, transform_indices = @transform_6, window_bounds = array<i64: 1, 128>}, {transform_indices = @transform_7, window_bounds = array<i64: 16, 128>}]} {
    %c0 = arith.constant 0 : index
    %c0_0 = arith.constant 0 : index
    %0 = vector.load %arg2[%c0, %c0_0] : memref<16x512xbf16, #tpu.memory_space<vmem>>, vector<16x512xbf16>
    %c0_1 = arith.constant 0 : index
    %c0_2 = arith.constant 0 : index
    %1 = vector.load %arg3[%c0_1, %c0_2] : memref<512x128xbf16, #tpu.memory_space<vmem>>, vector<512x128xbf16>
    %cst = arith.constant dense<0.000000e+00> : vector<16x128xf32>
    %2 = tpu.matmul %0, %1, %cst {dimension_numbers = #tpu.dot_dimension_numbers<[1], [0], [0], [1], [0, 0, 1, 1], [], []>} : vector<16x512xbf16>, vector<512x128xbf16>, vector<16x128xf32> -> vector<16x128xf32>
    %c0_3 = arith.constant 0 : index
    %c0_4 = arith.constant 0 : index
    %3 = vector.load %arg4[%c0_3, %c0_4] : memref<1x128xf32, #tpu.memory_space<vmem>>, vector<1x128xf32>
    %4 = vector.broadcast %3 : vector<1x128xf32> to vector<16x128xf32>
    %5 = arith.addf %2, %4 : vector<16x128xf32>
    %6 = tpu.iota {dimensions = array<i32: 0>} : vector<16x1xi32>
    %c0_5 = arith.constant 0 : index
    %c0_6 = arith.constant 0 : index
    %c0_7 = arith.constant 0 : index
    %7 = vector.load %arg5[%c0_5, %c0_6, %c0_7] : memref<2x1x128xf32, #tpu.memory_space<vmem>>, vector<1x1x128xf32>
    %8 = vector.shape_cast %7 : vector<1x1x128xf32> to vector<1x128xf32>
    %c0_i32 = arith.constant 0 : i32
    %9 = vector.broadcast %c0_i32 : i32 to vector<16x1xi32>
    %10 = arith.cmpi eq, %6, %9 : vector<16x1xi32>
    %11 = vector.shape_cast %10 : vector<16x1xi1> to vector<16x1xi1>
    %12 = vector.broadcast %11 : vector<16x1xi1> to vector<16x128xi1>
    %13 = vector.shape_cast %8 : vector<1x128xf32> to vector<1x128xf32>
    %14 = vector.broadcast %13 : vector<1x128xf32> to vector<16x128xf32>
    %15 = arith.select %12, %14, %5 : vector<16x128xi1>, vector<16x128xf32>
    %c1 = arith.constant 1 : index
    %c0_8 = arith.constant 0 : index
    %c0_9 = arith.constant 0 : index
    %16 = vector.load %arg5[%c1, %c0_8, %c0_9] : memref<2x1x128xf32, #tpu.memory_space<vmem>>, vector<1x1x128xf32>
    %17 = vector.shape_cast %16 : vector<1x1x128xf32> to vector<1x128xf32>
    %c8_i32 = arith.constant 8 : i32
    %18 = vector.broadcast %c8_i32 : i32 to vector<16x1xi32>
    %19 = arith.cmpi eq, %6, %18 : vector<16x1xi32>
    %20 = vector.shape_cast %19 : vector<16x1xi1> to vector<16x1xi1>
    %21 = vector.broadcast %20 : vector<16x1xi1> to vector<16x128xi1>
    %22 = vector.shape_cast %17 : vector<1x128xf32> to vector<1x128xf32>
    %23 = vector.broadcast %22 : vector<1x128xf32> to vector<16x128xf32>
    %24 = arith.select %21, %23, %15 : vector<16x128xi1>, vector<16x128xf32>
    %c0_10 = arith.constant 0 : index
    %c0_11 = arith.constant 0 : index
    %25 = vector.load %arg6[%c0_10, %c0_11] : memref<16x128xf32, #tpu.memory_space<vmem>>, vector<16x128xf32>
    %26 = arith.addf %24, %25 : vector<16x128xf32>
    %cst_12 = arith.constant dense<0.000000e+00> : vector<16xf32>
    %27 = vector.multi_reduction <add>, %26, %cst_12 [1] : vector<16x128xf32> to vector<16xf32>
    %28 = vector.shape_cast %27 : vector<16xf32> to vector<16x1xf32>
    %cst_13 = arith.constant 1.280000e+02 : f32
    %29 = vector.broadcast %cst_13 : f32 to vector<16x1xf32>
    %30 = arith.divf %28, %29 : vector<16x1xf32>
    %31 = arith.mulf %26, %26 : vector<16x128xf32>
    %cst_14 = arith.constant dense<0.000000e+00> : vector<16xf32>
    %32 = vector.multi_reduction <add>, %31, %cst_14 [1] : vector<16x128xf32> to vector<16xf32>
    %33 = vector.shape_cast %32 : vector<16xf32> to vector<16x1xf32>
    %cst_15 = arith.constant 1.280000e+02 : f32
    %34 = vector.broadcast %cst_15 : f32 to vector<16x1xf32>
    %35 = arith.divf %33, %34 : vector<16x1xf32>
    %36 = arith.mulf %30, %30 : vector<16x1xf32>
    %37 = arith.subf %35, %36 : vector<16x1xf32>
    %cst_16 = arith.constant 0.000000e+00 : f32
    %38 = vector.broadcast %cst_16 : f32 to vector<16x1xf32>
    %39 = arith.maximumf %37, %38 : vector<16x1xf32>
    %40 = vector.broadcast %30 : vector<16x1xf32> to vector<16x128xf32>
    %41 = arith.subf %26, %40 : vector<16x128xf32>
    %cst_17 = arith.constant 9.99999996E-13 : f32
    %42 = vector.broadcast %cst_17 : f32 to vector<16x1xf32>
    %43 = arith.addf %39, %42 : vector<16x1xf32>
    %44 = math.rsqrt %43 : vector<16x1xf32>
    %45 = vector.broadcast %44 : vector<16x1xf32> to vector<16x128xf32>
    %46 = arith.mulf %41, %45 : vector<16x128xf32>
    %c0_18 = arith.constant 0 : index
    %c0_19 = arith.constant 0 : index
    %47 = vector.load %arg7[%c0_18, %c0_19] : memref<1x128xf32, #tpu.memory_space<vmem>>, vector<1x128xf32>
    %48 = vector.broadcast %47 : vector<1x128xf32> to vector<16x128xf32>
    %49 = arith.mulf %46, %48 : vector<16x128xf32>
    %c0_20 = arith.constant 0 : index
    %c0_21 = arith.constant 0 : index
    %50 = vector.load %arg8[%c0_20, %c0_21] : memref<1x128xf32, #tpu.memory_space<vmem>>, vector<1x128xf32>
    %51 = vector.broadcast %50 : vector<1x128xf32> to vector<16x128xf32>
    %52 = arith.addf %49, %51 : vector<16x128xf32>
    %c0_22 = arith.constant 0 : index
    %c0_23 = arith.constant 0 : index
    %53 = vector.load %arg9[%c0_22, %c0_23] : memref<16x128xf32, #tpu.memory_space<vmem>>, vector<16x128xf32>
    tpu.vector_store %arg9[%c0_22, %c0_23], %52 {strides = array<i32>} : memref<16x128xf32, #tpu.memory_space<vmem>>, vector<16x128xf32>,
    return
  }
  func.func @transform_0(%arg0: i32, %arg1: i32) -> (i32, i32) {
    %c1_i32 = arith.constant 1 : i32
    %0 = arith.muli %arg0, %c1_i32 : i32
    %1 = arith.addi %0, %arg1 : i32
    %c0_i32 = arith.constant 0 : i32
    %c0_i32_0 = arith.constant 0 : i32
    return %1, %c0_i32 : i32, i32
  }
  func.func @transform_1(%arg0: i32, %arg1: i32) -> (i32, i32) {
    %c0_i32 = arith.constant 0 : i32
    %c0_i32_0 = arith.constant 0 : i32
    %c0_i32_1 = arith.constant 0 : i32
    return %c0_i32, %c0_i32_0 : i32, i32
  }
  func.func @transform_2(%arg0: i32, %arg1: i32) -> (i32, i32) {
    %c0_i32 = arith.constant 0 : i32
    %c0_i32_0 = arith.constant 0 : i32
    %c0_i32_1 = arith.constant 0 : i32
    return %c0_i32, %c0_i32_0 : i32, i32
  }
  func.func @transform_3(%arg0: i32, %arg1: i32) -> (i32, i32, i32) {
    %c0_i32 = arith.constant 0 : i32
    %c0_i32_0 = arith.constant 0 : i32
    %c0_i32_1 = arith.constant 0 : i32
    return %arg0, %c0_i32, %c0_i32_0 : i32, i32, i32
  }
  func.func @transform_4(%arg0: i32, %arg1: i32) -> (i32, i32) {
    %c0_i32 = arith.constant 0 : i32
    %c0_i32_0 = arith.constant 0 : i32
    %c0_i32_1 = arith.constant 0 : i32
    return %c0_i32, %c0_i32_0 : i32, i32
  }
  func.func @transform_5(%arg0: i32, %arg1: i32) -> (i32, i32) {
    %c0_i32 = arith.constant 0 : i32
    %c0_i32_0 = arith.constant 0 : i32
    %c0_i32_1 = arith.constant 0 : i32
    return %c0_i32, %c0_i32_0 : i32, i32
  }
  func.func @transform_6(%arg0: i32, %arg1: i32) -> (i32, i32) {
    %c0_i32 = arith.constant 0 : i32
    %c0_i32_0 = arith.constant 0 : i32
    %c0_i32_1 = arith.constant 0 : i32
    return %c0_i32, %c0_i32_0 : i32, i32
  }
  func.func @transform_7(%arg0: i32, %arg1: i32) -> (i32, i32) {
    %c1_i32 = arith.constant 1 : i32
    %0 = arith.muli %arg0, %c1_i32 : i32
    %1 = arith.addi %0, %arg1 : i32
    %c0_i32 = arith.constant 0 : i32
    %c0_i32_0 = arith.constant 0 : i32
    return %1, %c0_i32 : i32, i32
  }
}

</mosaic_0001>

<bundles_post_ra>
// kernel: tpu_custom_call.1
= control target key start
LH: loop header
LB: loop body
LE: loop exit
PB: predicated region body
PF: predicated region fallthrough
CT: control target
= control target key end

     0   :  { %12 = vsyncpa [#allocation3], 0  ;;  %s978_s0 = inlined_call_operand.hbm [shape: bf16[16,512], index: 0, kind: input, shape index: {}]   ;;  %s979_s1 = inlined_call_operand.hbm [shape: bf16[512,128], index: 1, kind: input, shape index: {}]   ;;  %s980_s2 = inlined_call_operand.hbm [shape: f32[1,128], index: 2, kind: input, shape index: {}]   ;;  %s981_s3 = inlined_call_operand.vmem [shape: f32[2,1,128], index: 3, kind: input, shape index: {}]   ;;  %s982_s4 = inlined_call_operand.hbm [shape: f32[16,128], index: 4, kind: input, shape index: {}]   ;;  %s983_s5 = inlined_call_operand.vmem [shape: f32[1,128], index: 5, kind: input, shape index: {}]   ;;  %s984_s6 = inlined_call_operand.vmem [shape: f32[1,128], index: 6, kind: input, shape index: {}]   ;;  %s985_s7 = inlined_call_operand.hbm [shape: f32[16,128], index: 7, kind: output, shape index: {}]  }
   0x1   :  { %13 = vsyncpa [#allocation6], 0 }
   0x2   :  { %14 = vsyncpa [#allocation9], 0  ;;  %s38_s26 = sshll.u32 %s979_s1, 4  ;;  %s39_s26 = int_to_ptr.hbm [resolvable:$true] %s38_s26 }
   0x3   :  { %15 = vsyncpa [#allocation4], 0  ;;  %s893_s27 = smov [#allocation5]   ;;  %s25_s8 = sshll.u32 %s978_s0, 4  ;;  %s26_s8 = int_to_ptr.hbm [resolvable:$true] %s25_s8 }
   0x4   :  { %s40_s28 = sshll.u32 %s893_s27, 4  ;;  %s894_s9 = smov 64   ;;  %s41_s28 = int_to_ptr.vmem [resolvable:$true] %s40_s28 }
   0x5   :  { %s895_s10 = smov 4   ;;  %s896_s11 = smov [#allocation2]  }
   0x6   :  { %46 = dma.hbm_to_vmem [thread:$0]  %s39_s26, 4096, %s41_s28, [#allocation6], %s894_s9, %s894_s9, %s895_s10  }
   0x7   :  { %s27_s12 = sshll.u32 %s896_s11, 4  ;;  %s897_s13 = smov 256   ;;  %s28_s12 = int_to_ptr.vmem [resolvable:$true] %s27_s12 }
   0x8   :  { %s898_s14 = smov 16   ;;  %s52_s16 = sshll.u32 %s980_s2, 4  ;;  %s53_s16 = int_to_ptr.hbm [resolvable:$true] %s52_s16 }
   0x9   :  { %33 = dma.hbm_to_vmem [thread:$0]  %s26_s8, 512, %s28_s12, [#allocation3], %s897_s13, %s897_s13, %s898_s14  }
   0xa   :  { %s899_s17 = smov [#allocation7]   ;;  %s64_s20 = sshll.u32 %s982_s4, 4  ;;  %s65_s20 = int_to_ptr.hbm [resolvable:$true] %s64_s20 }
   0xb   :  { %s54_s18 = sshll.u32 %s899_s17, 4  ;;  %s900_s21 = smov [#allocation8]   ;;  %s55_s18 = int_to_ptr.vmem [resolvable:$true] %s54_s18 }
   0xc   :  { %57 = dma.hbm_to_vmem [thread:$0]  %s53_s16, 16, %s55_s18, [#allocation6]  }
   0xd   :  { %s66_s22 = sshll.u32 %s900_s21, 4  ;;  %s901_s23 = smov 128   ;;  %s67_s22 = int_to_ptr.vmem [resolvable:$true] %s66_s22 }
   0xe   :  { %s902_s24 = smov 8  }
   0xf   :  { %72 = dma.hbm_to_vmem [thread:$0]  %s65_s20, 256, %s67_s22, [#allocation9], %s901_s23, %s901_s23, %s902_s24  }
  0x10   :  { %885 = dma.done.wait [#allocation3], 512  }
  0x11   :  { %886 = vsyncadd [#allocation3], 4294966784 }
  0x12   :  { %887 = dma.done.wait [#allocation6], 4112  }
  0x13   :  { %888 = vsyncadd [#allocation6], 4294963184 }
  0x14   :  { %889 = dma.done.wait [#allocation9], 256  }
  0x15   :  { %890 = vsyncadd [#allocation9], 4294967040  ;;  %v717_v0 = vld [vmem:[#allocation5 + $0x38] sm:$0xff]  ;;  %v716_v4 = vld [vmem:[#allocation5 + $0x30] sm:$0xff]  ;;  %v437_v47 = vlaneseq  ;;  %s546_s10 = sshll.u32 %s985_s7, 4  ;;  %s547_s10 = int_to_ptr.hbm [resolvable:$true] %s546_s10 }
  0x16   :  { %v725_v1 = vld [vmem:[#allocation5 + $0x78] sm:$0xff]  ;;  %381 = vmatpush.bf16.msra.mxu0 %v717_v0  ;;  %v724_v5 = vld [vmem:[#allocation5 + $0x70] sm:$0xff]  ;;  %v715_v8 = vld [vmem:[#allocation5 + $0x28] sm:$0xff] }
  0x17   :  { %v733_v2 = vld [vmem:[#allocation5 + $0xb8] sm:$0xff]  ;;  %395 = vmatpush.bf16.msra.mxu1 %v725_v1  ;;  %v732_v6 = vld [vmem:[#allocation5 + $0xb0] sm:$0xff]  ;;  %v723_v9 = vld [vmem:[#allocation5 + $0x68] sm:$0xff]  ;;  %v438_v50 = vshrl.u32 %v437_v47, 7 }
  0x18   :  { %v741_v3 = vld [vmem:[#allocation5 + $0xf8] sm:$0xff]  ;;  %409 = vmatpush.bf16.msra.mxu2 %v733_v2  ;;  %v740_v7 = vld [vmem:[#allocation5 + $0xf0] sm:$0xff]  ;;  %v731_v10 = vld [vmem:[#allocation5 + $0xa8] sm:$0xff] }
  0x19   :  { %423 = vmatpush.bf16.msra.mxu3 %v741_v3  ;;  %v739_v11 = vld [vmem:[#allocation5 + $0xe8] sm:$0xff]  ;;  %v714_v12 = vld [vmem:[#allocation5 + $0x20] sm:$0xff]  ;;  %v713_v16 = vld [vmem:[#allocation5 + $0x18] sm:$0xff]  ;;  %vm441_vm0 = vcmp.eq.s32.totalorder %v438_v50, 0  ;;  %v439_v62 = vadd.s32 8, %v438_v50 }
  0x1a   :  { %382 = vmatpush.bf16.msra.mxu0 %v716_v4  ;;  %v722_v13 = vld [vmem:[#allocation5 + $0x60] sm:$0xff]  ;;  %v721_v17 = vld [vmem:[#allocation5 + $0x58] sm:$0xff]  ;;  %v712_v20 = vld [vmem:[#allocation5 + $0x10] sm:$0xff] }
  0x1b   :  { %396 = vmatpush.bf16.msra.mxu1 %v724_v5  ;;  %v730_v14 = vld [vmem:[#allocation5 + $0xa0] sm:$0xff]  ;;  %v729_v18 = vld [vmem:[#allocation5 + $0x98] sm:$0xff]  ;;  %v720_v21 = vld [vmem:[#allocation5 + $0x50] sm:$0xff]  ;;  %vm455_vm1 = vcmp.eq.s32.totalorder %v439_v62, 8 }
  0x1c   :  { %410 = vmatpush.bf16.msra.mxu2 %v732_v6  ;;  %v738_v15 = vld [vmem:[#allocation5 + $0xe0] sm:$0xff]  ;;  %v737_v19 = vld [vmem:[#allocation5 + $0xd8] sm:$0xff]  ;;  %v728_v22 = vld [vmem:[#allocation5 + $0x90] sm:$0xff] }
  0x1d   :  { %424 = vmatpush.bf16.msra.mxu3 %v740_v7  ;;  %v736_v23 = vld [vmem:[#allocation5 + $0xd0] sm:$0xff]  ;;  %v711_v24 = vld [vmem:[#allocation5 + $0x8] sm:$0xff]  ;;  %v710_v28 = vld [vmem:[#allocation5] sm:$0xff] }
  0x1e   :  { %383 = vmatpush.bf16.msra.mxu0 %v715_v8  ;;  %v719_v25 = vld [vmem:[#allocation5 + $0x48] sm:$0xff]  ;;  %v718_v29 = vld [vmem:[#allocation5 + $0x40] sm:$0xff]  ;;  %v708_v33 = vld [vmem:[#allocation2 + $0xc] sm:$0xf0] }
  0x1f   :  { %397 = vmatpush.bf16.msra.mxu1 %v723_v9  ;;  %v727_v26 = vld [vmem:[#allocation5 + $0x88] sm:$0xff]  ;;  %v726_v30 = vld [vmem:[#allocation5 + $0x80] sm:$0xff]  ;;  %v565_v35 = vld [vmem:[#allocation2 + $0x10] sm:$0xf0] }
  0x20   :  { %411 = vmatpush.bf16.msra.mxu2 %v731_v10  ;;  %v735_v27 = vld [vmem:[#allocation5 + $0xc8] sm:$0xff]  ;;  %v734_v31 = vld [vmem:[#allocation5 + $0xc0] sm:$0xff]  ;;  %v709_v37 = vld [vmem:[#allocation2 + $0x14] sm:$0xf0]  ;;  %v903_v10 = vmov 128.0  }
  0x21   :  { %425 = vmatpush.bf16.msra.mxu3 %v739_v11  ;;  %v563_v32 = vld [vmem:[#allocation2] sm:$0xf]  ;;  %v706_v34 = vld [vmem:[#allocation2 + $0x4] sm:$0xf]  ;;  %v571_v36 = vld [vmem:[#allocation2 + $0x8] sm:$0xf]  ;;  %759 = vrcp.f32 %v903_v10 }
  0x22   :  { %384 = vmatpush.bf16.msra.mxu0 %v714_v12  ;;  %v707_v38 = vld [vmem:[#allocation2 + $0xc] sm:$0xf]  ;;  %v573_v39 = vld [vmem:[#allocation2 + $0x18] sm:$0xf0]  ;;  %v564_v40 = vor.u32 %v708_v33, %v563_v32  ;;  %v568_v41 = vor.u32 %v706_v34, %v565_v35  ;;  %v572_v42 = vor.u32 %v709_v37, %v571_v36  ;;  %v754_v44 = vld [vmem:[#allocation7] ss:$0 sm:$0xff] }
  0x23   :  { %398 = vmatpush.bf16.msra.mxu1 %v722_v13  ;;  %v576_v43 = vor.u32 %v707_v38, %v573_v39  ;;  %v755_v55 = vld [vmem:[%s981_s3] ss:$0 sm:$0xff]  ;;  %v465_v58 = vld [vmem:[#allocation8] sm:$0xff]  ;;  %v756_v3 = vld [vmem:[%s981_s3 + $0x1] ss:$0 sm:$0xff] }
  0x24   :  { %412 = vmatpush.bf16.msra.mxu2 %v730_v14  ;;  %v466_v6 = vld [vmem:[#allocation8 + $0x8] sm:$0xff] }
  0x25   :  { %426 = vmatpush.bf16.msra.mxu3 %v738_v15 }
  0x26   :  { %385 = vmatpush.bf16.msra.mxu0 %v713_v16 }
  0x27   :  { %399 = vmatpush.bf16.msra.mxu1 %v721_v17  ;;  %v760_v11 = vpop.eup %759 }
  0x28   :  { %413 = vmatpush.bf16.msra.mxu2 %v729_v18  ;;  %v474_v12 = vmul.f32 128.0, %v760_v11  ;;  %vm478_vm2 = vweird.f32 %v760_v11 }
  0x29   :  { %427 = vmatpush.bf16.msra.mxu3 %v737_v19 }
  0x2a   :  { %386 = vmatpush.bf16.msra.mxu0 %v712_v20  ;;  %v475_v13 = vsub.f32 1.0, %v474_v12 }
  0x2b   :  { %400 = vmatpush.bf16.msra.mxu1 %v720_v21 }
  0x2c   :  { %414 = vmatpush.bf16.msra.mxu2 %v728_v22  ;;  %v476_v14 = vmul.f32 %v760_v11, %v475_v13 }
  0x2d   :  { %428 = vmatpush.bf16.msra.mxu3 %v736_v23 }
  0x2e   :  { %387 = vmatpush.bf16.msra.mxu0 %v711_v24  ;;  %v477_v15 = vadd.f32 %v760_v11, %v476_v14 }
  0x2f   :  { %401 = vmatpush.bf16.msra.mxu1 %v719_v25 }
  0x30   :  { %415 = vmatpush.bf16.msra.mxu2 %v727_v26  ;;  %v479_v16 = vsel %vm478_vm2, %v760_v11, %v477_v15 }
  0x31   :  { %429 = vmatpush.bf16.msra.mxu3 %v735_v27 }
  0x32   :  { %388 = vmatpush.bf16.msra.mxu0 %v710_v28 }
  0x33   :  { %402 = vmatpush.bf16.msra.mxu1 %v718_v29 }
  0x34   :  { %416 = vmatpush.bf16.msra.mxu2 %v726_v30 }
  0x35   :  { %430 = vmatpush.bf16.msra.mxu3 %v734_v31  ;;  %389 = vmatmul.bf16.vlgmr.msra.gmra.mxu0 %v564_v40 }
  0x36   :  { %403 = vmatmul.bf16.vlgmr.msra.gmra.mxu1 %v568_v41 }
  0x37   :  { %417 = vmatmul.bf16.vlgmr.msra.gmra.mxu2 %v572_v42  ;;  %v757_v42 = vld [vmem:[%s983_s5] ss:$0 sm:$0xff]  ;;  %s904_s5 = smov [#allocation10]  }
  0x38   :  { %431 = vmatmul.bf16.vlgmr.msra.gmra.mxu3 %v576_v43  ;;  %s544_s30 = sshll.u32 %s904_s5, 4  ;;  %s545_s30 = int_to_ptr.vmem [resolvable:$true] %s544_s30 }
  0xb2   :  { %v390_v45 = vpop.f32.mrf.mxu0 }
  0xb3   :  { %v391_v46 = vadd.f32 %v754_v44, %v390_v45  ;;  %v404_v48 = vpop.f32.mrf.mxu1 }
  0xb5   :  { %v405_v49 = vadd.f32 %v404_v48, %v391_v46  ;;  %v758_v46 = vld [vmem:[%s984_s6] ss:$0 sm:$0xff] }
  0xba   :  { %v418_v51 = vpop.f32.mrf.mxu2  ;;  %v392_v54 = vpop.f32.mrf.mxu0 }
  0xbb   :  { %v432_v52 = vpop.f32.mrf.mxu3  ;;  %v419_v53 = vadd.f32 %v418_v51, %v405_v49  ;;  %v393_v57 = vadd.f32 %v754_v44, %v392_v54  ;;  %v406_v60 = vpop.f32.mrf.mxu1 }
  0xbd   :  { %v433_v56 = vadd.f32 %v432_v52, %v419_v53  ;;  %v407_v63 = vadd.f32 %v406_v60, %v393_v57 }
  0xbf   :  { %v450_v59 = vsel %vm441_vm0, %v755_v55, %v433_v56 }
  0xc0   :  { %v467_v61 = vadd.f32 %v465_v58, %v450_v59 }
  0xc2   :  { %v420_v0 = vpop.f32.mrf.mxu2  ;;  %469 = vadd.xlane.f32.xlu0 %v467_v61  ;;  %v482_v1 = vmul.f32 %v467_v61, %v467_v61 }
  0xc3   :  { %v421_v2 = vadd.f32 %v420_v0, %v407_v63  ;;  %v434_v4 = vpop.f32.mrf.mxu3 }
  0xc4   :  { %484 = vadd.xlane.f32.xlu1 %v482_v1 }
  0xc5   :  { %v435_v5 = vadd.f32 %v434_v4, %v421_v2 }
  0xc7   :  { %v464_v7 = vsel %vm455_vm1, %v756_v3, %v435_v5 }
  0xc8   :  { %v468_v8 = vadd.f32 %v466_v6, %v464_v7 }
  0xca   :  { %471 = vadd.xlane.f32.xlu0 %v468_v8  ;;  %v483_v9 = vmul.f32 %v468_v8, %v468_v8 }
  0xcc   :  { %486 = vadd.xlane.f32.xlu1 %v483_v9 }
 0x135   :  { %v470_v17 = vpop.xlane.xlu0 %469 }
 0x136   :  { %v480_v18 = vmul.f32 %v479_v16, %v470_v17 }
 0x137   :  { %v485_v19 = vpop.xlane.xlu1 %484 }
 0x138   :  { %v490_v20 = vmul.f32 %v480_v18, %v480_v18  ;;  %v488_v21 = vmul.f32 %v485_v19, %v479_v16  ;;  %v496_v40 = vsub.f32 %v467_v61, %v480_v18 }
 0x13a   :  { %v492_v22 = vsub.f32 %v488_v21, %v490_v20 }
 0x13c   :  { %v494_v23 = vmax.f32 %v492_v22, 0.0 }
 0x13d   :  { %v472_v24 = vpop.xlane.xlu0 %471 }
 0x13e   :  { %v498_v25 = vadd.f32 1e-12, %v494_v23  ;;  %v481_v26 = vmul.f32 %v479_v16, %v472_v24 }
 0x13f   :  { %v487_v27 = vpop.xlane.xlu1 %486 }
 0x140   :  { %761 = vrsqrt.f32 %v498_v25  ;;  %v491_v28 = vmul.f32 %v481_v26, %v481_v26  ;;  %v489_v29 = vmul.f32 %v487_v27, %v479_v16  ;;  %vm506_vm4 = vweird.f32 %v498_v25 }
 0x141   :  { %v497_v52 = vsub.f32 %v468_v8, %v481_v26 }
 0x142   :  { %v493_v30 = vsub.f32 %v489_v29, %v491_v28 }
 0x144   :  { %v495_v31 = vmax.f32 %v493_v30, 0.0 }
 0x146   :  { %v762_v32 = vpop.eup %761  ;;  %v499_v34 = vadd.f32 1e-12, %v495_v31 }
 0x147   :  { %v501_v33 = vmul.f32 %v762_v32, %v498_v25  ;;  %vm507_vm3 = vweird.f32 %v762_v32 }
 0x148   :  { %763 = vrsqrt.f32 %v499_v34  ;;  %vm508_vm5 = vmor %vm506_vm4, %vm507_vm3  ;;  %vm516_vm7 = vweird.f32 %v499_v34 }
 0x149   :  { %v502_v35 = vmul.f32 %v762_v32, %v501_v33 }
 0x14b   :  { %v503_v36 = vmul.f32 0.5, %v502_v35 }
 0x14d   :  { %v504_v37 = vsub.f32 1.5, %v503_v36 }
 0x14e   :  { %v764_v38 = vpop.eup %763 }
 0x14f   :  { %v505_v39 = vmul.f32 %v762_v32, %v504_v37  ;;  %v511_v41 = vmul.f32 %v764_v38, %v499_v34  ;;  %vm517_vm6 = vweird.f32 %v764_v38 }
 0x150   :  { %vm518_vm8 = vmor %vm516_vm7, %vm517_vm6 }
 0x151   :  { %v509_v43 = vsel %vm508_vm5, %v762_v32, %v505_v39  ;;  %v512_v44 = vmul.f32 %v764_v38, %v511_v41 }
 0x152   :  { %v520_v45 = vmul.f32 %v509_v43, %v496_v40 }
 0x153   :  { %v513_v47 = vmul.f32 0.5, %v512_v44 }
 0x154   :  { %v526_v48 = vmul.f32 %v757_v42, %v520_v45 }
 0x155   :  { %v514_v49 = vsub.f32 1.5, %v513_v47 }
 0x156   :  { %v532_v50 = vadd.f32 %v758_v46, %v526_v48 }
 0x157   :  { %v515_v51 = vmul.f32 %v764_v38, %v514_v49 }
 0x158   :  { %534 = vst [vmem:[#allocation10] sm:$0xff] %v532_v50 }
 0x159   :  { %v519_v53 = vsel %vm518_vm8, %v764_v38, %v515_v51 }
 0x15a   :  { %v521_v54 = vmul.f32 %v519_v53, %v497_v52 }
 0x15c   :  { %v527_v55 = vmul.f32 %v757_v42, %v521_v54 }
 0x15e   :  { %v533_v56 = vadd.f32 %v758_v46, %v527_v55 }
 0x160   :  { %535 = vst [vmem:[#allocation10 + $0x8] sm:$0xff] %v533_v56 }
 0x161   :  { %552 = dma.vmem_to_hbm [thread:$0]  %s545_s30, 256, %s547_s10, [#allocation4], %s901_s23, %s901_s23, %s902_s24  }
 0x162   :  { %891 = dma.done.wait [#allocation4], 256  }
 0x163   :  { %892 = vsyncadd [#allocation4], 4294967040 }
 0x164   :  { %557 = vsyncpa [#allocation3], 1 }
 0x165   :  { %558 = vsyncpa [#allocation6], 1 }
 0x166   :  { %559 = vsyncpa [#allocation9], 1 }
 0x167   :  { %560 = vsyncpa [#allocation4], 1 }

</bundles_post_ra>
